<compile_context>
chip_gen: v7x
topology: tpu7x:2x2x1
jax: 0.10.0
libtpu: 0.0.40
codegen_flags: <defaults>
</compile_context>

<pallas_src>
import jax
import jax.numpy as jnp
from jax.experimental import pallas as pl
from jax.experimental.pallas import tpu as pltpu


def _round_up(x: int, m: int) -> int:
    return ((x + m - 1) // m) * m


def _cdiv(a: int, b: int) -> int:
    return (a + b - 1) // b


def _sensor_encoder_kernel(x_ref, w1_ref, b1_ref, w2_ref, b2_ref, w3_ref, b3_ref, o_ref):
    cdt = w1_ref.dtype  # compute dtype for MXU operands (bf16 or f32)
    # In-kernel cast: x arrives in its native dtype (no wrapper prepass); the
    # VPU cast is hidden under the x tile DMA.
    x = x_ref[...].astype(cdt)
    # fc[0] (normalization pre-folded into W1/b1) + ReLU
    h1 = jnp.dot(x, w1_ref[...], preferred_element_type=jnp.float32) + b1_ref[...]
    h1 = jnp.maximum(h1, 0.0).astype(cdt)
    # fc[2] + ReLU
    h2 = jnp.dot(h1, w2_ref[...], preferred_element_type=jnp.float32) + b2_ref[...]
    h2 = jnp.maximum(h2, 0.0).astype(cdt)
    # fc[4]
    y = jnp.dot(h2, w3_ref[...], preferred_element_type=jnp.float32) + b3_ref[...]
    o_ref[...] = y.astype(o_ref.dtype)


def _choose_batch_tiling(B: int, target: int):
    """Pick (bt, n_tiles, B_pad).

    Tiles sized near `target`, balanced across the grid (minimal tail padding),
    >=4 grid steps for pipelining when the batch allows, and an even grid length
    so both v7x TensorCores get equal work (no effect on v5e/v6e).
    """
    n = max(1, _cdiv(B, max(16, target)))
    if B >= 4 * 16:
        n = max(n, 4)           # enough steps to pipeline
    elif B >= 2 * 16:
        n = max(n, 2)           # at least keep both v7x cores busy
    if n > 1 and n % 2 == 1:
        n += 1                  # even grid for megacore balance
    bt = _round_up(_cdiv(B, n), 16)   # multiple of 16 (sublane packing for bf16)
    n = _cdiv(B, bt)
    if n > 1 and n % 2 == 1:
        n += 1
    return bt, n, n * bt


def _vmem_limit_bytes() -> int:
    # Per-generation VMEM limit with headroom: ~3/4 of physical capacity
    # (96 MiB on v5e/v6e with 128 MiB, 48 MiB on v7x with 64 MiB per TC).
    try:
        cap = pltpu.get_tpu_info().vmem_capacity_bytes
    except Exception:
        cap = 64 * 1024 * 1024
    return int(min(max(cap * 3 // 4, 32 * 1024 * 1024), 112 * 1024 * 1024))


def sensor_encoder(x, avg, std, params, *, normalization=True, batch_tile=2048,
                   compute_dtype=jnp.bfloat16):
    """x: (B, input_dim).  avg/std: (input_dim,).  params: torch-style Linear weights."""
    B, input_dim = x.shape

    # Torch Linear weights are (out, in): pre-transpose so the kernel does x @ W.
    w1 = params["w1"].T.astype(jnp.float32)   # (in, hidden)
    w2 = params["w2"].T.astype(jnp.float32)   # (hidden, hidden)
    w3 = params["w3"].T.astype(jnp.float32)   # (hidden, out)
    b1 = params["b1"].astype(jnp.float32)
    b2 = params["b2"].astype(jnp.float32)
    b3 = params["b3"].astype(jnp.float32)
    hidden_dim = w1.shape[1]
    output_dim = w3.shape[1]

    # Fold (x - avg) / std into the first layer (one-time wrapper algebra, in f32).
    if normalization:
        inv_std = 1.0 / std.astype(jnp.float32)
        w1 = w1 * inv_std[:, None]                      # diag(1/std) @ W1^T
        b1 = b1 - avg.astype(jnp.float32) @ w1          # b1 - (avg/std) @ W1^T

    # MXU operands in the requested compute dtype; biases & accumulation stay f32.
    w1c = w1.astype(compute_dtype)
    w2c = w2.astype(compute_dtype)
    w3c = w3.astype(compute_dtype)
    b1r, b2r, b3r = b1[None, :], b2[None, :], b3[None, :]

    # Batch tiling (large tiles, minimal tail padding, even grid for v7x).
    bt, n_tiles, B_pad = _choose_batch_tiling(B, batch_tile)
    # x keeps its native dtype; pad batch rows only when B isn't tile-aligned.
    x_in = x if B_pad == B else jnp.pad(x, ((0, B_pad - B), (0, 0)))

    def rep(shape):
        # Full-extent block, replicated across the batch grid (constant block
        # index -> stays VMEM-resident; tiny at these layer sizes).
        return pl.BlockSpec(shape, lambda i: (0,) * len(shape))

    out = pl.pallas_call(
        _sensor_encoder_kernel,
        out_shape=jax.ShapeDtypeStruct((B_pad, output_dim), jnp.float32),
        grid_spec=pltpu.PrefetchScalarGridSpec(
            num_scalar_prefetch=0,
            grid=(n_tiles,),
            in_specs=[
                pl.BlockSpec((bt, input_dim), lambda i: (i, 0)),   # x (native dtype)
                rep((input_dim, hidden_dim)),                      # W1 (norm folded)
                rep((1, hidden_dim)),                              # b1 (norm folded)
                rep((hidden_dim, hidden_dim)),                     # W2
                rep((1, hidden_dim)),                              # b2
                rep((hidden_dim, output_dim)),                     # W3 (no lane padding)
                rep((1, output_dim)),                              # b3
            ],
            # Output block last dim == output_dim (full-extent): no 8x padded
            # f32 writeback, no wrapper column-slice pass.
            out_specs=pl.BlockSpec((bt, output_dim), lambda i: (i, 0)),
        ),
        compiler_params=pltpu.CompilerParams(
            dimension_semantics=("parallel",),
            vmem_limit_bytes=_vmem_limit_bytes(),
        ),
    )(x_in, w1c, b1r, w2c, b2r, w3c, b3r)

    return out if B_pad == B else out[:B]


def sensor_encoder_ref(x, avg, std, params, normalization=True):
    if normalization:
        x = (x - avg[None, :]) / std[None, :]
    h1 = jnp.maximum(x @ params["w1"].T + params["b1"], 0.0)
    h2 = jnp.maximum(h1 @ params["w2"].T + params["b2"], 0.0)
    return h2 @ params["w3"].T + params["b3"]


if __name__ == "__main__":
    # Small shapes consistent with the module's forward.
    B, input_dim, hidden_dim, output_dim = 16, 32, 64, 16

    key = jax.random.PRNGKey(0)
    keys = jax.random.split(key, 9)

    x = jax.random.normal(keys[0], (B, input_dim), dtype=jnp.float32)
    avg = jax.random.normal(keys[1], (input_dim,), dtype=jnp.float32) * 0.1
    std = jnp.abs(jax.random.normal(keys[2], (input_dim,), dtype=jnp.float32)) + 0.5

    # Torch-style parameters (weight shape = (out_features, in_features)).
    params = {
        "w1": jax.random.normal(keys[3], (hidden_dim, input_dim), jnp.float32) * 0.1,
        "b1": jax.random.normal(keys[4], (hidden_dim,), jnp.float32) * 0.01,
        "w2": jax.random.normal(keys[5], (hidden_dim, hidden_dim), jnp.float32) * 0.1,
        "b2": jax.random.normal(keys[6], (hidden_dim,), jnp.float32) * 0.01,
        "w3": jax.random.normal(keys[7], (output_dim, hidden_dim), jnp.float32) * 0.1,
        "b3": jnp.zeros((output_dim,), jnp.float32),
    }

    ref = sensor_encoder_ref(x, avg, std, params, normalization=True)

    # Default fast path: bf16 MXU operands, f32 accumulation, in-kernel cast of x.
    out_bf16 = jax.block_until_ready(
        sensor_encoder(x, avg, std, params, normalization=True))
    assert out_bf16.shape == (B, output_dim)
    assert jnp.allclose(out_bf16, ref, atol=5e-2, rtol=5e-2), "bf16 kernel mismatch vs reference"

    # Full-precision path: tight tolerance against the f32 reference.
    out_f32 = jax.block_until_ready(
        sensor_encoder(x, avg, std, params, normalization=True, compute_dtype=jnp.float32))
    assert jnp.allclose(out_f32, ref, atol=1e-4, rtol=1e-4), "f32 kernel mismatch vs reference"

    # normalization=False path.
    ref_nn = sensor_encoder_ref(x, avg, std, params, normalization=False)
    out_nn = jax.block_until_ready(
        sensor_encoder(x, avg, std, params, normalization=False, compute_dtype=jnp.float32))
    assert jnp.allclose(out_nn, ref_nn, atol=1e-4, rtol=1e-4), "no-norm kernel mismatch vs reference"

    # Unaligned batch: exercises tail padding / multi-tile even grid path.
    B2 = 40
    x2 = jax.random.normal(keys[8], (B2, input_dim), dtype=jnp.float32)
    ref2 = sensor_encoder_ref(x2, avg, std, params, normalization=True)
    out2 = jax.block_until_ready(
        sensor_encoder(x2, avg, std, params, normalization=True, compute_dtype=jnp.float32))
    assert out2.shape == (B2, output_dim)
    assert jnp.allclose(out2, ref2, atol=1e-4, rtol=1e-4), "padded-batch kernel mismatch vs reference"

    print("KERNEL_OK")
</pallas_src>

<mosaic_0001>
module attributes {stable_mosaic.version = 11 : i64} {
  func.func @_sensor_encoder_kernel(%arg0: i32, %arg1: memref<16x32xf32, #tpu.memory_space<vmem>>, %arg2: memref<32x64xbf16, #tpu.memory_space<vmem>>, %arg3: memref<1x64xf32, #tpu.memory_space<vmem>>, %arg4: memref<64x64xbf16, #tpu.memory_space<vmem>>, %arg5: memref<1x64xf32, #tpu.memory_space<vmem>>, %arg6: memref<64x16xbf16, #tpu.memory_space<vmem>>, %arg7: memref<1x16xf32, #tpu.memory_space<vmem>>, %arg8: memref<16x16xf32, #tpu.memory_space<vmem>>) attributes {dimension_semantics = [#tpu.dimension_semantics<parallel>], iteration_bounds = array<i64: 1>, scalar_prefetch = 0 : i64, scratch_operands = 0 : i64, tpu.core_type = #tpu.core_type<tc>, window_params = [{transform_indices = @transform_0, window_bounds = array<i64: 16, 32>}, {pipeline_mode = #tpu.pipeline_mode<synchronous>, transform_indices = @transform_1, window_bounds = array<i64: 32, 64>}, {pipeline_mode = #tpu.pipeline_mode<synchronous>, transform_indices = @transform_2, window_bounds = array<i64: 1, 64>}, {pipeline_mode = #tpu.pipeline_mode<synchronous>, transform_indices = @transform_3, window_bounds = array<i64: 64, 64>}, {pipeline_mode = #tpu.pipeline_mode<synchronous>, transform_indices = @transform_4, window_bounds = array<i64: 1, 64>}, {pipeline_mode = #tpu.pipeline_mode<synchronous>, transform_indices = @transform_5, window_bounds = array<i64: 64, 16>}, {pipeline_mode = #tpu.pipeline_mode<synchronous>, transform_indices = @transform_6, window_bounds = array<i64: 1, 16>}, {transform_indices = @transform_7, window_bounds = array<i64: 16, 16>}]} {
    %c0 = arith.constant 0 : index
    %c0_0 = arith.constant 0 : index
    %0 = vector.load %arg1[%c0, %c0_0] : memref<16x32xf32, #tpu.memory_space<vmem>>, vector<16x32xf32>
    %1 = arith.truncf %0 : vector<16x32xf32> to vector<16x32xbf16>
    %c0_1 = arith.constant 0 : index
    %c0_2 = arith.constant 0 : index
    %2 = vector.load %arg2[%c0_1, %c0_2] : memref<32x64xbf16, #tpu.memory_space<vmem>>, vector<32x64xbf16>
    %cst = arith.constant dense<0.000000e+00> : vector<16x64xf32>
    %3 = tpu.matmul %1, %2, %cst {dimension_numbers = #tpu.dot_dimension_numbers<[1], [0], [0], [1], [0, 0, 1, 1], [], []>} : vector<16x32xbf16>, vector<32x64xbf16>, vector<16x64xf32> -> vector<16x64xf32>
    %c0_3 = arith.constant 0 : index
    %c0_4 = arith.constant 0 : index
    %4 = vector.load %arg3[%c0_3, %c0_4] : memref<1x64xf32, #tpu.memory_space<vmem>>, vector<1x64xf32>
    %5 = vector.broadcast %4 : vector<1x64xf32> to vector<16x64xf32>
    %6 = arith.addf %3, %5 : vector<16x64xf32>
    %cst_5 = arith.constant 0.000000e+00 : f32
    %7 = vector.broadcast %cst_5 : f32 to vector<16x64xf32>
    %8 = arith.maximumf %6, %7 : vector<16x64xf32>
    %9 = arith.truncf %8 : vector<16x64xf32> to vector<16x64xbf16>
    %c0_6 = arith.constant 0 : index
    %c0_7 = arith.constant 0 : index
    %10 = vector.load %arg4[%c0_6, %c0_7] : memref<64x64xbf16, #tpu.memory_space<vmem>>, vector<64x64xbf16>
    %cst_8 = arith.constant dense<0.000000e+00> : vector<16x64xf32>
    %11 = tpu.matmul %9, %10, %cst_8 {dimension_numbers = #tpu.dot_dimension_numbers<[1], [0], [0], [1], [0, 0, 1, 1], [], []>} : vector<16x64xbf16>, vector<64x64xbf16>, vector<16x64xf32> -> vector<16x64xf32>
    %c0_9 = arith.constant 0 : index
    %c0_10 = arith.constant 0 : index
    %12 = vector.load %arg5[%c0_9, %c0_10] : memref<1x64xf32, #tpu.memory_space<vmem>>, vector<1x64xf32>
    %13 = vector.broadcast %12 : vector<1x64xf32> to vector<16x64xf32>
    %14 = arith.addf %11, %13 : vector<16x64xf32>
    %cst_11 = arith.constant 0.000000e+00 : f32
    %15 = vector.broadcast %cst_11 : f32 to vector<16x64xf32>
    %16 = arith.maximumf %14, %15 : vector<16x64xf32>
    %17 = arith.truncf %16 : vector<16x64xf32> to vector<16x64xbf16>
    %c0_12 = arith.constant 0 : index
    %c0_13 = arith.constant 0 : index
    %18 = vector.load %arg6[%c0_12, %c0_13] : memref<64x16xbf16, #tpu.memory_space<vmem>>, vector<64x16xbf16>
    %cst_14 = arith.constant dense<0.000000e+00> : vector<16x16xf32>
    %19 = tpu.matmul %17, %18, %cst_14 {dimension_numbers = #tpu.dot_dimension_numbers<[1], [0], [0], [1], [0, 0, 1, 1], [], []>} : vector<16x64xbf16>, vector<64x16xbf16>, vector<16x16xf32> -> vector<16x16xf32>
    %c0_15 = arith.constant 0 : index
    %c0_16 = arith.constant 0 : index
    %20 = vector.load %arg7[%c0_15, %c0_16] : memref<1x16xf32, #tpu.memory_space<vmem>>, vector<1x16xf32>
    %21 = vector.broadcast %20 : vector<1x16xf32> to vector<16x16xf32>
    %22 = arith.addf %19, %21 : vector<16x16xf32>
    %c0_17 = arith.constant 0 : index
    %c0_18 = arith.constant 0 : index
    %23 = vector.load %arg8[%c0_17, %c0_18] : memref<16x16xf32, #tpu.memory_space<vmem>>, vector<16x16xf32>
    tpu.vector_store %arg8[%c0_17, %c0_18], %22 {strides = array<i32>} : memref<16x16xf32, #tpu.memory_space<vmem>>, vector<16x16xf32>,
    return
  }
  func.func @transform_0(%arg0: i32) -> (i32, i32) {
    %c0_i32 = arith.constant 0 : i32
    %c0_i32_0 = arith.constant 0 : i32
    return %arg0, %c0_i32 : i32, i32
  }
  func.func @transform_1(%arg0: i32) -> (i32, i32) {
    %c0_i32 = arith.constant 0 : i32
    %c0_i32_0 = arith.constant 0 : i32
    %c0_i32_1 = arith.constant 0 : i32
    return %c0_i32, %c0_i32_0 : i32, i32
  }
  func.func @transform_2(%arg0: i32) -> (i32, i32) {
    %c0_i32 = arith.constant 0 : i32
    %c0_i32_0 = arith.constant 0 : i32
    %c0_i32_1 = arith.constant 0 : i32
    return %c0_i32, %c0_i32_0 : i32, i32
  }
  func.func @transform_3(%arg0: i32) -> (i32, i32) {
    %c0_i32 = arith.constant 0 : i32
    %c0_i32_0 = arith.constant 0 : i32
    %c0_i32_1 = arith.constant 0 : i32
    return %c0_i32, %c0_i32_0 : i32, i32
  }
  func.func @transform_4(%arg0: i32) -> (i32, i32) {
    %c0_i32 = arith.constant 0 : i32
    %c0_i32_0 = arith.constant 0 : i32
    %c0_i32_1 = arith.constant 0 : i32
    return %c0_i32, %c0_i32_0 : i32, i32
  }
  func.func @transform_5(%arg0: i32) -> (i32, i32) {
    %c0_i32 = arith.constant 0 : i32
    %c0_i32_0 = arith.constant 0 : i32
    %c0_i32_1 = arith.constant 0 : i32
    return %c0_i32, %c0_i32_0 : i32, i32
  }
  func.func @transform_6(%arg0: i32) -> (i32, i32) {
    %c0_i32 = arith.constant 0 : i32
    %c0_i32_0 = arith.constant 0 : i32
    %c0_i32_1 = arith.constant 0 : i32
    return %c0_i32, %c0_i32_0 : i32, i32
  }
  func.func @transform_7(%arg0: i32) -> (i32, i32) {
    %c0_i32 = arith.constant 0 : i32
    %c0_i32_0 = arith.constant 0 : i32
    return %arg0, %c0_i32 : i32, i32
  }
}

</mosaic_0001>

<bundles_post_ra>
// kernel: tpu_custom_call.1
= control target key start
LH: loop header
LB: loop body
LE: loop exit
PB: predicated region body
PF: predicated region fallthrough
CT: control target
= control target key end

     0   :  { %12 = vsyncpa [#allocation3], 0  ;;  %s549_s0 = inlined_call_operand.vmem [shape: f32[16,32], index: 0, kind: input, shape index: {}]   ;;  %s550_s1 = inlined_call_operand.hbm [shape: bf16[32,64], index: 1, kind: input, shape index: {}]   ;;  %s551_s2 = inlined_call_operand.vmem [shape: f32[1,64], index: 2, kind: input, shape index: {}]   ;;  %s552_s3 = inlined_call_operand.vmem [shape: bf16[64,64], index: 3, kind: input, shape index: {}]   ;;  %s553_s4 = inlined_call_operand.vmem [shape: f32[1,64], index: 4, kind: input, shape index: {}]   ;;  %s554_s5 = inlined_call_operand.vmem [shape: bf16[64,16], index: 5, kind: input, shape index: {}]   ;;  %s555_s6 = inlined_call_operand.vmem [shape: f32[1,16], index: 6, kind: input, shape index: {}]   ;;  %s556_s7 = inlined_call_operand.hbm [shape: f32[16,16], index: 7, kind: output, shape index: {}]  }
   0x1   :  { %13 = vsyncpa [#allocation4], 0  ;;  %s433_s24 = smov [#allocation2]   ;;  %s385_s28 = scalar_lea.hbm %s550_s1, 256 }
   0x2   :  { %s21_s25 = sshll.u32 %s433_s24, 4  ;;  %p386_p0 = scmp.ne.s32.totalorder %s550_s1, %s385_s28  ;;  %s22_s25 = int_to_ptr.vmem [resolvable:$true] %s21_s25 }
   0x3   :  { %p389_p1 = scmp.lt.u32.totalorder %s385_s28, %s550_s1 }
   0x5   :  { %p391_p2 = pnand %p389_p1, %p386_p0 }
   0x7   :  { %394 = shalt.err (!%p391_p2)
}
   0x8   :  { %s395_s10 = scalar_lea.vmem %s22_s25, 256  ;;  %p400_p4 = scmp.lt.s32.totalorder %s22_s25, %s22_s25 }
   0x9   :  { %p396_p3 = scmp.ne.s32.totalorder %s22_s25, %s395_s10  ;;  %p401_p5 = scmp.lt.s32.totalorder %s395_s10, %s395_s10 }
   0xb   :  { %p402_p6 = por %p401_p5, %p400_p4 }
   0xd   :  { %p403_p7 = pnand %p402_p6, %p396_p3 }
   0xf   :  { %406 = shalt.err (!%p403_p7)
}
  0x10   :  { %s434_s11 = smov 64   ;;  %s435_s12 = smov 4  }
  0x11   :  { %27 = dma.hbm_to_vmem [thread:$0]  %s550_s1, 256, %s22_s25, [#allocation3], %s434_s11, %s434_s11, %s435_s12  }
  0x12   :  { %429 = dma.done.wait [#allocation3], 256  }
  0x13   :  { %430 = vsyncadd [#allocation3], 4294967040  ;;  %v436_v0 = vmov 0.0   ;;  %vm437_vm0 = vmmov 0   ;;  %v375_v1 = vld [vmem:[#allocation2] sm:$0xff]   ;;  %v376_v2 = vld [vmem:[#allocation2 + $0x8] sm:$0xff]  }
  0x14   :  { %335 = vmatprep.subr.bf16.mxu0 %v436_v0  ;;  %339 = vmatprep.mubr.msk.bf16.mxu0 %vm437_vm0, %v436_v0  ;;  %v42_v3 = vld [vmem:[%s549_s0] sm:$0xff]  ;;  %v43_v4 = vld [vmem:[%s549_s0 + $0x8] sm:$0xff]  ;;  %vm68_vm1 = vcmask 261120   ;;  %v379_v8 = vld [vmem:[%s552_s3 + $0x10] sm:$0xff]   ;;  %vm155_vm2 = vcmask 523264   ;;  %vm286_vm3 = vcmask 130048  }
  0x15   :  { %343 = vmatprep.subr.bf16.mxu1 %v436_v0  ;;  %351 = vmatprep.mubr.msk.bf16.mxu1 %vm437_vm0, %v436_v0  ;;  %v377_v5 = vld [vmem:[%s552_s3] sm:$0xff]   ;;  %v378_v6 = vld [vmem:[%s552_s3 + $0x8] sm:$0xff]   ;;  %v44_v7 = vpack.c.bf16 %v43_v4, %v42_v3  ;;  %v380_v9 = vld [vmem:[%s552_s3 + $0x18] sm:$0xff]  }
  0x16   :  { %336 = vmatpush3.bf16.msra.mxu0 %v375_v1  ;;  %344 = vmatpush3.bf16.msra.mxu1 %v377_v5  ;;  %v381_v10 = vld [vmem:[%s554_s5] sm:$0xff]   ;;  %v382_v11 = vld [vmem:[%s554_s5 + $0x8] sm:$0xff]   ;;  %v383_v22 = vld [vmem:[%s554_s5 + $0x10] sm:$0xff]  }
  0x17   :  { %337 = vmatprep.subr.bf16.mxu0 %v436_v0  ;;  %345 = vmatprep.subr.bf16.mxu1 %v436_v0  ;;  %v306_v12 = vld [vmem:[%s551_s2] ss:$0 sm:$0xff]  ;;  %v384_v23 = vld [vmem:[%s554_s5 + $0x18] sm:$0xff]   ;;  %s438_s5 = smov [#allocation5]  }
  0x18   :  { %v310_v24 = vld [vmem:[%s553_s4] ss:$0 sm:$0xff]  ;;  %s294_s14 = sshll.u32 %s438_s5, 4  ;;  %s295_s14 = int_to_ptr.vmem [resolvable:$true] %s294_s14 }
  0x19   :  { %v316_v34 = vld [vmem:[%s555_s6] ss:$0 sm:$0xff]  ;;  %s407_s4 = scalar_lea.vmem %s295_s14, 256  ;;  %p412_p9 = scmp.lt.s32.totalorder %s295_s14, %s295_s14 }
  0x1a   :  { %338 = vmatpush3.bf16.msra.mxu0 %v376_v2  ;;  %346 = vmatpush3.bf16.msra.mxu1 %v378_v6  ;;  %p408_p8 = scmp.ne.s32.totalorder %s295_s14, %s407_s4  ;;  %p413_p10 = scmp.lt.s32.totalorder %s407_s4, %s407_s4 }
  0x1b   :  { %355 = vmatprep.subr.bf16.mxu0 %v436_v0  ;;  %347 = vmatprep.subr.bf16.mxu1 %v436_v0 }
  0x1c   :  { %p414_p11 = por %p413_p10, %p412_p9 }
  0x1d   :  { %340 = vmatmul.mubr.msk.bf16.vlgmr.msra.gmra.mrb[0].mxu0 %vm68_vm1, %v44_v7 }
  0x1e   :  { %363 = vmatprep.mubr.msk.bf16.mxu0 %vm437_vm0, %v436_v0  ;;  %348 = vmatpush3.bf16.msra.mxu1 %v379_v8  ;;  %p415_p12 = pnand %p414_p11, %p408_p8 }
  0x1f   :  { %349 = vmatprep.subr.bf16.mxu1 %v436_v0  ;;  %356 = vmatpush3.bf16.msra.mxu0 %v381_v10 }
  0x20   :  { %357 = vmatprep.subr.bf16.mxu0 %v436_v0 }
  0x22   :  { %350 = vmatpush3.bf16.msra.mxu1 %v380_v9 }
  0x23   :  { %358 = vmatpush3.bf16.msra.mxu0 %v382_v11 }
  0x24   :  { %359 = vmatprep.subr.bf16.mxu0 %v436_v0 }
  0x27   :  { %360 = vmatpush3.bf16.msra.mxu0 %v383_v22 }
  0x28   :  { %361 = vmatprep.subr.bf16.mxu0 %v436_v0 }
  0x2b   :  { %362 = vmatpush3.bf16.msra.mxu0 %v384_v23 }
  0xf0   :  { %v106_v13 = vpop.f32.mrb[0].mxu0 }
  0xf1   :  { %v107_v14 = vadd.f32 %v306_v12, %v106_v13  ;;  %v341_v15 = vpop.f32.mrb[1].mxu0 }
  0xf2   :  { %v109_v16 = vpop.f32.mrb[2].mxu0 }
  0xf3   :  { %v110_v17 = vadd.f32 %v306_v12, %v109_v16  ;;  %v342_v18 = vpop.f32.mrb[3].mxu0  ;;  %v113_v19 = vmax.f32 %v107_v14, 0.0 }
  0xf5   :  { %v114_v20 = vmax.f32 %v110_v17, 0.0 }
  0xf7   :  { %v115_v21 = vpack.c.bf16 %v114_v20, %v113_v19 }
  0xf9   :  { %352 = vmatmul.mubr.msk.bf16.vlgmr.msra.gmra.mrb[0].mxu1 %vm155_vm2, %v115_v21 }
 0x1cc   :  { %v193_v25 = vpop.f32.mrb[0].mxu1 }
 0x1cd   :  { %v194_v26 = vadd.f32 %v310_v24, %v193_v25  ;;  %v353_v27 = vpop.f32.mrb[1].mxu1 }
 0x1ce   :  { %v196_v28 = vpop.f32.mrb[2].mxu1 }
 0x1cf   :  { %v197_v29 = vadd.f32 %v310_v24, %v196_v28  ;;  %v354_v30 = vpop.f32.mrb[3].mxu1  ;;  %v200_v31 = vmax.f32 %v194_v26, 0.0 }
 0x1d1   :  { %v201_v32 = vmax.f32 %v197_v29, 0.0 }
 0x1d3   :  { %v202_v33 = vpack.c.bf16 %v201_v32, %v200_v31 }
 0x1d5   :  { %364 = vmatmul.mubr.msk.bf16.vlgmr.msra.gmra.mrb[4].mxu0 %vm155_vm2, %v202_v33 }
 0x2a8   :  { %v279_v35 = vpop.f32.mrb[4].mxu0 }
 0x2a9   :  { %v280_v36 = vadd.f32 %v316_v34, %v279_v35  ;;  %v365_v37 = vpop.f32.mrb[5].mxu0 }
 0x2aa   :  { %v282_v38 = vpop.f32.mrb[6].mxu0 }
 0x2ab   :  { %287 = vst.msk [vmem:[#allocation5] sm:$0xff] %vm286_vm3, %v280_v36  ;;  %v283_v39 = vadd.f32 %v316_v34, %v282_v38  ;;  %v366_v40 = vpop.f32.mrb[7].mxu0 }
 0x2ad   :  { %288 = vst.msk [vmem:[#allocation5 + $0x8] sm:$0xff] %vm286_vm3, %v283_v39 }
 0x2ae   :  { %418 = shalt.err (!%p415_p12)
}
 0x2af   :  { %s419_s16 = scalar_lea.hbm %s556_s7, 256 }
 0x2b0   :  { %p420_p13 = scmp.ne.s32.totalorder %s556_s7, %s419_s16  ;;  %p423_p0 = scmp.lt.u32.totalorder %s419_s16, %s556_s7 }
 0x2b2   :  { %p425_p1 = pnand %p423_p0, %p420_p13 }
 0x2b4   :  { %428 = shalt.err (!%p425_p1)
}
 0x2b5   :  { %s439_s20 = smov 128   ;;  %s440_s21 = smov 8  }
 0x2b6   :  { %300 = dma.vmem_to_hbm [thread:$0]  %s295_s14, 256, %s556_s7, [#allocation4], %s439_s20, %s439_s20, %s440_s21  }
 0x2b7   :  { %431 = dma.done.wait [#allocation4], 256  }
 0x2b8   :  { %432 = vsyncadd [#allocation4], 4294967040 }
 0x2b9   :  { %304 = vsyncpa [#allocation3], 1 }
 0x2ba   :  { %305 = vsyncpa [#allocation4], 1 }

</bundles_post_ra>
